<compile_context>
chip_gen: v6e
topology: v6e:2x2x1
jax: 0.10.0
libtpu: 0.0.40
codegen_flags: <defaults>
</compile_context>

<pallas_src>
import functools

import jax
import jax.numpy as jnp
from jax.experimental import pallas as pl
from jax.experimental.pallas import tpu as pltpu


def _spectral_gn_kernel(x_ref, gamma_ref, beta_ref, o_ref, *, eps):
    # x_ref    : (nb, G, cpg, S, HW)  -- nb samples, all groups / spectral slices
    # gamma_ref: (1,  G, cpg, 1, 1)
    # beta_ref : (1,  G, cpg, 1, 1)
    x = x_ref[...].astype(jnp.float32)
    cpg = x.shape[2]
    hw = x.shape[4]
    inv_n = 1.0 / float(cpg * hw)

    # Per-(sample, group, spectral) statistics: reduce over channels-in-group (axis 2,
    # vreg-wise adds) and spatial lanes (axis 4, XLU lane reduce), keeping S.
    mean = jnp.sum(jnp.sum(x, axis=4, keepdims=True), axis=2, keepdims=True) * inv_n
    xc = x - mean                                                   # (nb,G,cpg,S,HW)
    var = jnp.sum(jnp.sum(xc * xc, axis=4, keepdims=True), axis=2, keepdims=True) * inv_n
    inv_std = jax.lax.rsqrt(var + eps)                              # (nb,G,1,S,1)

    gamma = gamma_ref[...].astype(jnp.float32)                      # (1,G,cpg,1,1)
    beta = beta_ref[...].astype(jnp.float32)
    o_ref[...] = (xc * (inv_std * gamma) + beta).astype(o_ref.dtype)


def _pick_rows_per_block(n, per_row_bytes, budget_bytes):
    """Largest divisor of n whose block stays under the VMEM budget; keep >=2 blocks."""
    cap = max(1, budget_bytes // max(per_row_bytes, 1))
    if n >= 2:
        cap = min(cap, n // 2)  # >=2 grid blocks -> megacore sharding on v7x
    cap = max(1, min(cap, n))
    for d in range(cap, 0, -1):
        if n % d == 0:
            return d
    return 1


def spectral_normalize_gn(x, gamma, beta, *, eps=1e-5, block_budget_bytes=4 << 20):
    """x: (N, C, S, H, W); gamma, beta: (C,). Returns same shape/dtype as x."""
    N, C, S, H, W = x.shape
    G = 8 if C >= 8 else 1
    assert C % G == 0, "num_features must be divisible by num_groups"
    cpg = C // G
    HW = H * W

    # Free reshapes only (adjacent-dim split/merge) -- no transposes, no extra HBM traffic.
    x_r = x.reshape(N, G, cpg, S, HW)
    gamma_r = gamma.reshape(1, G, cpg, 1, 1).astype(x.dtype)
    beta_r = beta.reshape(1, G, cpg, 1, 1).astype(x.dtype)

    itemsize = x.dtype.itemsize
    per_row_bytes = C * S * HW * itemsize
    nb = _pick_rows_per_block(N, per_row_bytes, block_budget_bytes)
    grid = (N // nb,)

    block_bytes = nb * per_row_bytes
    # in + out, double-buffered, plus slack for params/scratch.
    vmem_limit = int(max(4 * block_bytes + (1 << 20), 16 << 20))

    cost = pl.CostEstimate(
        flops=7 * x.size,                      # sums, centering, scale+shift
        transcendentals=N * G * S,             # one rsqrt per (sample, group, spectral)
        bytes_accessed=2 * x.size * itemsize + 2 * C * itemsize,
    )

    kernel = functools.partial(_spectral_gn_kernel, eps=eps)

    out_r = pl.pallas_call(
        kernel,
        out_shape=jax.ShapeDtypeStruct((N, G, cpg, S, HW), x.dtype),
        grid=grid,
        in_specs=[
            pl.BlockSpec((nb, G, cpg, S, HW), lambda i: (i, 0, 0, 0, 0)),
            pl.BlockSpec((1, G, cpg, 1, 1), lambda i: (0, 0, 0, 0, 0)),  # resident
            pl.BlockSpec((1, G, cpg, 1, 1), lambda i: (0, 0, 0, 0, 0)),  # resident
        ],
        out_specs=pl.BlockSpec((nb, G, cpg, S, HW), lambda i: (i, 0, 0, 0, 0)),
        compiler_params=pltpu.CompilerParams(
            dimension_semantics=("parallel",),
            vmem_limit_bytes=vmem_limit,
        ),
        cost_estimate=cost,
    )(x_r, gamma_r, beta_r)

    # Free reshape back to the PyTorch layout.
    return out_r.reshape(N, C, S, H, W)


def _reference(x, gamma, beta, eps=1e-5):
    # Plain-JAX GroupNorm applied per spectral slice (sanity check).
    N, C, S, H, W = x.shape
    G = 8 if C >= 8 else 1
    cpg = C // G
    xr = x.transpose(0, 2, 1, 3, 4).reshape(N, S, G, cpg, H, W).astype(jnp.float32)
    mean = xr.mean(axis=(3, 4, 5), keepdims=True)
    var = ((xr - mean) ** 2).mean(axis=(3, 4, 5), keepdims=True)
    y = (xr - mean) / jnp.sqrt(var + eps)
    y = y.reshape(N, S, C, H, W)
    y = y * gamma[None, None, :, None, None] + beta[None, None, :, None, None]
    return y.transpose(0, 2, 1, 3, 4).astype(x.dtype)


if __name__ == "__main__":
    key = jax.random.PRNGKey(0)
    k_x, k_g, k_b = jax.random.split(key, 3)

    N, C, S, H, W = 2, 16, 4, 8, 8  # num_features=16 -> 8 groups; num_spectral=4
    x = jax.random.normal(k_x, (N, C, S, H, W), dtype=jnp.float32)
    # Affine params shared across spectral indices, as in the module.
    gamma = 1.0 + 0.1 * jax.random.normal(k_g, (C,), dtype=jnp.float32)
    beta = 0.1 * jax.random.normal(k_b, (C,), dtype=jnp.float32)

    out = spectral_normalize_gn(x, gamma, beta)
    out = jax.block_until_ready(out)

    ref = _reference(x, gamma, beta)
    assert out.shape == x.shape and out.dtype == x.dtype
    assert jnp.max(jnp.abs(out - ref)) < 1e-4, "mismatch vs. reference GroupNorm"

    print("KERNEL_OK")
</pallas_src>

<mosaic_0001>
module attributes {stable_mosaic.version = 11 : i64} {
  func.func @_spectral_gn_kernel(%arg0: i32, %arg1: memref<1x8x2x4x64xf32, #tpu.memory_space<vmem>>, %arg2: memref<1x8x2x1x1xf32, #tpu.memory_space<vmem>>, %arg3: memref<1x8x2x1x1xf32, #tpu.memory_space<vmem>>, %arg4: memref<1x8x2x4x64xf32, #tpu.memory_space<vmem>>) attributes {dimension_semantics = [#tpu.dimension_semantics<parallel>], iteration_bounds = array<i64: 2>, scalar_prefetch = 0 : i64, scratch_operands = 0 : i64, tpu.core_type = #tpu.core_type<tc>, window_params = [{transform_indices = @transform_0, window_bounds = array<i64: 1, 8, 2, 4, 64>}, {pipeline_mode = #tpu.pipeline_mode<synchronous>, transform_indices = @transform_1, window_bounds = array<i64: 1, 8, 2, 1, 1>}, {pipeline_mode = #tpu.pipeline_mode<synchronous>, transform_indices = @transform_2, window_bounds = array<i64: 1, 8, 2, 1, 1>}, {transform_indices = @transform_3, window_bounds = array<i64: 1, 8, 2, 4, 64>}]} {
    %c0 = arith.constant 0 : index
    %c0_0 = arith.constant 0 : index
    %c0_1 = arith.constant 0 : index
    %c0_2 = arith.constant 0 : index
    %c0_3 = arith.constant 0 : index
    %0 = vector.load %arg1[%c0, %c0_0, %c0_1, %c0_2, %c0_3] : memref<1x8x2x4x64xf32, #tpu.memory_space<vmem>>, vector<1x8x2x4x64xf32>
    %cst = arith.constant dense<0.000000e+00> : vector<1x8x2x4xf32>
    %1 = vector.multi_reduction <add>, %0, %cst [4] : vector<1x8x2x4x64xf32> to vector<1x8x2x4xf32>
    %2 = vector.shape_cast %1 : vector<1x8x2x4xf32> to vector<1x8x2x4x1xf32>
    %cst_4 = arith.constant dense<0.000000e+00> : vector<1x8x4x1xf32>
    %3 = vector.multi_reduction <add>, %2, %cst_4 [2] : vector<1x8x2x4x1xf32> to vector<1x8x4x1xf32>
    %4 = vector.shape_cast %3 : vector<1x8x4x1xf32> to vector<1x8x1x4x1xf32>
    %cst_5 = arith.constant 7.812500e-03 : f32
    %5 = vector.broadcast %cst_5 : f32 to vector<1x8x1x4x1xf32>
    %6 = arith.mulf %4, %5 : vector<1x8x1x4x1xf32>
    %7 = vector.broadcast %6 : vector<1x8x1x4x1xf32> to vector<1x8x2x4x64xf32>
    %8 = arith.subf %0, %7 : vector<1x8x2x4x64xf32>
    %9 = arith.mulf %8, %8 : vector<1x8x2x4x64xf32>
    %cst_6 = arith.constant dense<0.000000e+00> : vector<1x8x2x4xf32>
    %10 = vector.multi_reduction <add>, %9, %cst_6 [4] : vector<1x8x2x4x64xf32> to vector<1x8x2x4xf32>
    %11 = vector.shape_cast %10 : vector<1x8x2x4xf32> to vector<1x8x2x4x1xf32>
    %cst_7 = arith.constant dense<0.000000e+00> : vector<1x8x4x1xf32>
    %12 = vector.multi_reduction <add>, %11, %cst_7 [2] : vector<1x8x2x4x1xf32> to vector<1x8x4x1xf32>
    %13 = vector.shape_cast %12 : vector<1x8x4x1xf32> to vector<1x8x1x4x1xf32>
    %cst_8 = arith.constant 7.812500e-03 : f32
    %14 = vector.broadcast %cst_8 : f32 to vector<1x8x1x4x1xf32>
    %15 = arith.mulf %13, %14 : vector<1x8x1x4x1xf32>
    %cst_9 = arith.constant 9.99999974E-6 : f32
    %16 = vector.broadcast %cst_9 : f32 to vector<1x8x1x4x1xf32>
    %17 = arith.addf %15, %16 : vector<1x8x1x4x1xf32>
    %18 = math.rsqrt %17 : vector<1x8x1x4x1xf32>
    %c0_10 = arith.constant 0 : index
    %c0_11 = arith.constant 0 : index
    %c0_12 = arith.constant 0 : index
    %c0_13 = arith.constant 0 : index
    %c0_14 = arith.constant 0 : index
    %19 = vector.load %arg2[%c0_10, %c0_11, %c0_12, %c0_13, %c0_14] : memref<1x8x2x1x1xf32, #tpu.memory_space<vmem>>, vector<1x8x2x1x1xf32>
    %c0_15 = arith.constant 0 : index
    %c0_16 = arith.constant 0 : index
    %c0_17 = arith.constant 0 : index
    %c0_18 = arith.constant 0 : index
    %c0_19 = arith.constant 0 : index
    %20 = vector.load %arg3[%c0_15, %c0_16, %c0_17, %c0_18, %c0_19] : memref<1x8x2x1x1xf32, #tpu.memory_space<vmem>>, vector<1x8x2x1x1xf32>
    %21 = vector.broadcast %18 : vector<1x8x1x4x1xf32> to vector<1x8x2x4x1xf32>
    %22 = vector.broadcast %19 : vector<1x8x2x1x1xf32> to vector<1x8x2x4x1xf32>
    %23 = arith.mulf %21, %22 : vector<1x8x2x4x1xf32>
    %24 = vector.broadcast %23 : vector<1x8x2x4x1xf32> to vector<1x8x2x4x64xf32>
    %25 = arith.mulf %8, %24 : vector<1x8x2x4x64xf32>
    %26 = vector.broadcast %20 : vector<1x8x2x1x1xf32> to vector<1x8x2x4x64xf32>
    %27 = arith.addf %25, %26 : vector<1x8x2x4x64xf32>
    %c0_20 = arith.constant 0 : index
    %c0_21 = arith.constant 0 : index
    %c0_22 = arith.constant 0 : index
    %c0_23 = arith.constant 0 : index
    %c0_24 = arith.constant 0 : index
    %28 = vector.load %arg4[%c0_20, %c0_21, %c0_22, %c0_23, %c0_24] : memref<1x8x2x4x64xf32, #tpu.memory_space<vmem>>, vector<1x8x2x4x64xf32>
    tpu.vector_store %arg4[%c0_20, %c0_21, %c0_22, %c0_23, %c0_24], %27 {strides = array<i32>} : memref<1x8x2x4x64xf32, #tpu.memory_space<vmem>>, vector<1x8x2x4x64xf32>,
    return
  }
  func.func @transform_0(%arg0: i32) -> (i32, i32, i32, i32, i32) {
    %c0_i32 = arith.constant 0 : i32
    %c0_i32_0 = arith.constant 0 : i32
    %c0_i32_1 = arith.constant 0 : i32
    %c0_i32_2 = arith.constant 0 : i32
    %c0_i32_3 = arith.constant 0 : i32
    return %arg0, %c0_i32, %c0_i32_0, %c0_i32_1, %c0_i32_2 : i32, i32, i32, i32, i32
  }
  func.func @transform_1(%arg0: i32) -> (i32, i32, i32, i32, i32) {
    %c0_i32 = arith.constant 0 : i32
    %c0_i32_0 = arith.constant 0 : i32
    %c0_i32_1 = arith.constant 0 : i32
    %c0_i32_2 = arith.constant 0 : i32
    %c0_i32_3 = arith.constant 0 : i32
    %c0_i32_4 = arith.constant 0 : i32
    return %c0_i32, %c0_i32_0, %c0_i32_1, %c0_i32_2, %c0_i32_3 : i32, i32, i32, i32, i32
  }
  func.func @transform_2(%arg0: i32) -> (i32, i32, i32, i32, i32) {
    %c0_i32 = arith.constant 0 : i32
    %c0_i32_0 = arith.constant 0 : i32
    %c0_i32_1 = arith.constant 0 : i32
    %c0_i32_2 = arith.constant 0 : i32
    %c0_i32_3 = arith.constant 0 : i32
    %c0_i32_4 = arith.constant 0 : i32
    return %c0_i32, %c0_i32_0, %c0_i32_1, %c0_i32_2, %c0_i32_3 : i32, i32, i32, i32, i32
  }
  func.func @transform_3(%arg0: i32) -> (i32, i32, i32, i32, i32) {
    %c0_i32 = arith.constant 0 : i32
    %c0_i32_0 = arith.constant 0 : i32
    %c0_i32_1 = arith.constant 0 : i32
    %c0_i32_2 = arith.constant 0 : i32
    %c0_i32_3 = arith.constant 0 : i32
    return %arg0, %c0_i32, %c0_i32_0, %c0_i32_1, %c0_i32_2 : i32, i32, i32, i32, i32
  }
}

</mosaic_0001>

<bundles_post_ra>
// kernel: tpu_custom_call.1
= control target key start
LH: loop header
LB: loop body
LE: loop exit
PB: predicated region body
PF: predicated region fallthrough
CT: control target
= control target key end

     0   :  { %8 = vsyncpa [#allocation3], 0  ;;  %s1671_s0 = inlined_call_operand.hbm [shape: f32[2,8,2,4,64], index: 0, kind: input, shape index: {}]   ;;  %s1672_s1 = inlined_call_operand.vmem [shape: f32[1,8,2,1,1], index: 1, kind: input, shape index: {}]   ;;  %s1673_s2 = inlined_call_operand.vmem [shape: f32[1,8,2,1,1], index: 2, kind: input, shape index: {}]   ;;  %s1674_s3 = inlined_call_operand.hbm [shape: f32[2,8,2,4,64], index: 3, kind: output, shape index: {}]  }
   0x1   :  { %10 = vsyncpa [#allocation3 + $0x1], 0 }
   0x2   :  { %11 = vsyncpa [#allocation4], 0 }
   0x3   :  { %13 = vsyncpa [#allocation4 + $0x1], 0  ;;  %s1156_s12 = smov 0   ;;  %s1158_s13 = smov 0  }
   0x4   :  { %s1160_s14 = smov 0   ;;  %s1162_s15 = smov 0  }
   0x5 LB: > { %s1177_s16 = sadd.s32 4294967295, %s1127_s15   ;;  %s918_s17 = sadd.s32 4294967294, %s1127_s15   ;;  %s1127_s15 = sphi %s1162_s15, %s1689_s15   ;;  %s1123_s14 = sphi %s1160_s14, %s1688_s14   ;;  %s1119_s13 = sphi %s1158_s13, %s1687_s13   ;;  %s1115_s12 = sphi %s1156_s12, %s1686_s12  }
   0x6   : > { %s1181_s18 = sadd.s32 1, %s1127_s15   ;;  %s26_s19 = sadd.s32 1, %s1123_s14 }
   0x7   : > { %s23_s20 = ssub.s32 %s1127_s15, %s1181_s18  ;;  %p33_p0 = scmp.ne.s32.totalorder %s1123_s14, %s1119_s13 }
   0x8   : > { %p24_p1 = scmp.eq.s32.totalorder %s23_s20, 0  ;;  %p34_p2 = scmp.eq.s32.totalorder %s1127_s15, 0 }
   0x9   : > { %p39_p3 = scmp.ne.s32.totalorder %s1119_s13, %s1115_s12  ;;  %p40_p4 = scmp.eq.s32.totalorder %s1177_s16, 0 }
   0xa   : > { %s1193_s21 = scalar_select %p24_p1, %s1123_s14, %s26_s19  }
   0xb   : > { %p1195_p5 = por %p34_p2, %p33_p0  ;;  %p1199_p6 = por %p40_p4, %p39_p3 }
   0xc   : > { %p105_p7 = scmp.eq.s32.totalorder %s1177_s16, 1  ;;  %p111_p8 = scmp.eq.s32.totalorder %s918_s17, 1 }
   0xd   : > { %s1678_s23 = scalar_select %p1199_p6, 1, 0 }
   0xe   : > { %p978_p10 = scmp.lt.s32.totalorder %s1127_s15, 2  ;;  %p1206_p11 = por %p105_p7, %p33_p0 }
   0xf   : > { %p1210_p12 = por %p111_p8, %p39_p3  ;;  %s137_s26 = sand.u32 1, %s1123_s14  }
  0x10   : > { %s1679_s24 = scalar_select %p1206_p11, 1, 0 }
  0x11   : > { %s1680_s25 = scalar_select %p1210_p12, 1, 0 }
  0x12   : > { %s964_s27 = sshll.u32 %s1127_s15, 10  ;;  %s921_s28 = sshll.u32 %s137_s26, 6 }
  0x13   : > { %s1219_s4 = scalar_lea.hbm %s1671_s0, %s964_s27  ;;  %s141_s5 = scalar_lea.vmem [#allocation2], %s921_s28 }
  0x14   : > { %s148_s6 = sshll.u32 %s141_s5, 4  ;;  %p1223_p13 = pnand %p978_p10, %p1195_p5  ;;  %s1227_s6 = int_to_ptr.vmem [resolvable:$true] %s148_s6 }
  0x15   : > { %s1229_s8 = scalar_lea.sflag [#allocation3], %s137_s26  ;;  %s1035_s9 = scalar_lea.hbm %s1219_s4, 1024 }
  0x16   : > { %p1036_p0 = scmp.ne.s32.totalorder %s1219_s4, %s1035_s9  ;;  %p1037_p1 = pneg %p1223_p13 }
  0x17   : > { %s1040_s17 = scalar_lea.hbm %s1671_s0, 2048  ;;  %p1041_p4 = scmp.lt.s32.totalorder %s1219_s4, %s1671_s0 }
  0x18   : > { %p1038_p2 = pnand %p1037_p1, %p1036_p0  ;;  %p1042_p5 = scmp.lt.s32.totalorder %s1040_s17, %s1035_s9 }
  0x1a   : > { %p1039_p3 = pneg %p1038_p2  ;;  %p1043_p7 = por %p1042_p5, %p1041_p4 }
  0x1c   : > { %p1044_p8 = pnand %p1043_p7, %p1039_p3 }
  0x1e   : > { %1047 = shalt.err (!%p1044_p8)
}
  0x1f   : > { %s1048_s22 = scalar_lea.vmem %s1227_s6, 1024  ;;  %s1129_s26 = smov [#allocation2]  }
  0x20   : > { %p1049_p10 = scmp.ne.s32.totalorder %s1227_s6, %s1048_s22  ;;  %s1053_s27 = sshll.u32 %s1129_s26, 4  ;;  %s1054_s27 = int_to_ptr.vmem [resolvable:$false] %s1053_s27 }
  0x21   : > { %s1055_s28 = scalar_lea.vmem %s1054_s27, 2048  ;;  %p1056_p2 = scmp.lt.s32.totalorder %s1227_s6, %s1054_s27 }
  0x22   : > { %p1051_p9 = pnand %p1049_p10, %p1037_p1  ;;  %p1057_p12 = scmp.lt.s32.totalorder %s1055_s28, %s1048_s22 }
  0x24   : > { %p1052_p0 = pneg %p1051_p9  ;;  %p1058_p11 = por %p1057_p12, %p1056_p2 }
  0x26   : > { %p1059_p6 = pnand %p1058_p11, %p1052_p0 }
  0x28   : > { %1062 = shalt.err (!%p1059_p6)
}
  0x29   : > { %s1130_s29 = smov 64   ;;  %s1131_s30 = smov 4  }
  0x2a   : > { %973 = dma.hbm_to_vmem [thread:$0]  (!%p1223_p13), %s1219_s4, 1024, %s1227_s6, %s1229_s8, %s1130_s29, %s1130_s29, %s1131_s30  }
  0x2b   : > { %p924_p9 = scmp.ge.s32.totalorder %s1127_s15, 1  ;;  %p156_p1 = scmp.lt.s32.totalorder %s1127_s15, 3 }
  0x2d   : > { %p157_p3 = pnand %p924_p9, %p156_p1 }
  0x2e   : > { %s1253_s5 = sand.u32 (!%p157_p3), 1, %s1119_s13   ;;  %p1682_p6 = scmp.ne.s32.totalorder (!%p157_p3), %s1678_s23, 0 }
  0x2f   : > { %160 = sbr.rel (%p157_p3) target bundleno = 597 (0x255), region = 32  ;;  %s925_s9 = sshll.u32 (!%p157_p3), %s1253_s5, 6 }
  0x30   : > { %s163_s10 = scalar_lea.sflag (!%p157_p3), [#allocation3], %s1253_s5  ;;  %s1259_s11 = scalar_lea.vmem (!%p157_p3), [#allocation2], %s925_s9 }
  0x34   : > { %1106 = dma.done.wait (%p1682_p6), %s163_s10, 1024  }
  0x35   : > { %1108 = vsyncadd (%p1682_p6), %s163_s10, 4294966272  ;;  %vm205_vm0 = vcmask 519168   ;;  %v1266_v0 = vld [vmem:[%s1259_s11 + $0x8] sm:$0xf]  ;;  %v1269_v1 = vld [vmem:[%s1259_s11] sm:$0xf] }
  0x36   : > { %v1272_v2 = vld [vmem:[%s1259_s11 + $0xc] sm:$0xf]  ;;  %v212_v3 = vsel %vm205_vm0, %v1266_v0, 0.0  ;;  %v206_v4 = vsel %vm205_vm0, %v1269_v1, 0.0  ;;  %v1279_v5 = vld [vmem:[%s1259_s11 + $0x4] sm:$0xf] }
  0x37   : > { %213 = vadd.xlane.f32.xlu1 %v212_v3  ;;  %207 = vadd.xlane.f32.xlu0 %v206_v4  ;;  %v215_v6 = vsel %vm205_vm0, %v1272_v2, 0.0  ;;  %v209_v7 = vsel %vm205_vm0, %v1279_v5, 0.0  ;;  %v1286_v8 = vld [vmem:[%s1259_s11 + $0x14] sm:$0xf]  ;;  %v1289_v9 = vld [vmem:[%s1259_s11 + $0x10] sm:$0xf] }
  0x38   : > { %v221_v10 = vsel %vm205_vm0, %v1286_v8, 0.0  ;;  %v218_v11 = vsel %vm205_vm0, %v1289_v9, 0.0  ;;  %v1296_v12 = vld [vmem:[%s1259_s11 + $0x1c] sm:$0xf]  ;;  %v1299_v13 = vld [vmem:[%s1259_s11 + $0x18] sm:$0xf] }
  0x39   : > { %v227_v14 = vsel %vm205_vm0, %v1296_v12, 0.0  ;;  %v224_v15 = vsel %vm205_vm0, %v1299_v13, 0.0  ;;  %v1306_v16 = vld [vmem:[%s1259_s11 + $0x24] sm:$0xf]  ;;  %v1309_v17 = vld [vmem:[%s1259_s11 + $0x20] sm:$0xf] }
  0x3a   : > { %v233_v18 = vsel %vm205_vm0, %v1306_v16, 0.0  ;;  %v230_v19 = vsel %vm205_vm0, %v1309_v17, 0.0  ;;  %v1316_v20 = vld [vmem:[%s1259_s11 + $0x2c] sm:$0xf]  ;;  %v1319_v21 = vld [vmem:[%s1259_s11 + $0x28] sm:$0xf] }
  0x3b   : > { %216 = vadd.xlane.f32.xlu1 %v215_v6  ;;  %210 = vadd.xlane.f32.xlu0 %v209_v7  ;;  %v239_v22 = vsel %vm205_vm0, %v1316_v20, 0.0  ;;  %v236_v23 = vsel %vm205_vm0, %v1319_v21, 0.0  ;;  %v1326_v24 = vld [vmem:[%s1259_s11 + $0x34] sm:$0xf]  ;;  %v1329_v25 = vld [vmem:[%s1259_s11 + $0x30] sm:$0xf] }
  0x3c   : > { %v245_v26 = vsel %vm205_vm0, %v1326_v24, 0.0  ;;  %v242_v27 = vsel %vm205_vm0, %v1329_v25, 0.0  ;;  %v1336_v28 = vld [vmem:[%s1259_s11 + $0x3c] sm:$0xf]  ;;  %v1339_v29 = vld [vmem:[%s1259_s11 + $0x38] sm:$0xf] }
  0x3d   : > { %v251_v30 = vsel %vm205_vm0, %v1336_v28, 0.0  ;;  %v248_v31 = vsel %vm205_vm0, %v1339_v29, 0.0  ;;  %v1132_v32 = vmov 0   ;;  %vm254_vm1 = vcmask 1043456   ;;  %s1573_s23 = scalar_lea.vmem [#allocation5], %s925_s9  ;;  %s965_s9 = sshll.u32 %s1177_s16, 10 }
  0x3e   : > { %1017 = vset.pattern.permute.xlu1 %v1132_v32  ;;  %1018 = vset.pattern.permute.xlu0 %v1132_v32  ;;  %s845_s4 = sshll.u32 %s1573_s23, 4  ;;  %s1622_s8 = scalar_lea.hbm %s1674_s3, %s965_s9  ;;  %s1624_s4 = int_to_ptr.vmem [resolvable:$true] %s845_s4 }
  0x3f   : > { %222 = vadd.xlane.f32.xlu1 %v221_v10  ;;  %219 = vadd.xlane.f32.xlu0 %v218_v11  ;;  %s832_s16 = scalar_lea.sflag [#allocation4], %s1253_s5  ;;  %s1063_s17 = scalar_lea.vmem %s1624_s4, 1024 }
  0x40   : > { %p1064_p11 = scmp.ne.s32.totalorder %s1624_s4, %s1063_s17  ;;  %p1683_p12 = scmp.ne.s32.totalorder %s1679_s24, 0 }
  0x41   : > { %s1133_s19 = smov [#allocation5]  }
  0x42   : > { %p1065_p13 = pnand %p1064_p11, %p1683_p12  ;;  %s1067_s20 = sshll.u32 %s1133_s19, 4  ;;  %s1068_s20 = int_to_ptr.vmem [resolvable:$false] %s1067_s20 }
  0x43   : > { %228 = vadd.xlane.f32.xlu1 %v227_v14  ;;  %225 = vadd.xlane.f32.xlu0 %v224_v15  ;;  %s1069_s22 = scalar_lea.vmem %s1068_s20, 2048  ;;  %p1070_p5 = scmp.lt.s32.totalorder %s1624_s4, %s1068_s20 }
  0x44   : > { %p1066_p4 = pneg %p1065_p13  ;;  %p1071_p7 = scmp.lt.s32.totalorder %s1069_s22, %s1063_s17 }
  0x46   : > { %p1072_p8 = por %p1071_p7, %p1070_p5 }
  0x47   : > { %234 = vadd.xlane.f32.xlu1 %v233_v18  ;;  %231 = vadd.xlane.f32.xlu0 %v230_v19 }
  0x48   : > { %p1073_p10 = pnand %p1072_p8, %p1066_p4 }
  0x4b   : > { %240 = vadd.xlane.f32.xlu1 %v239_v22  ;;  %237 = vadd.xlane.f32.xlu0 %v236_v23 }
  0x4f   : > { %246 = vadd.xlane.f32.xlu1 %v245_v26  ;;  %243 = vadd.xlane.f32.xlu0 %v242_v27 }
  0x53   : > { %252 = vadd.xlane.f32.xlu1 %v251_v30  ;;  %249 = vadd.xlane.f32.xlu0 %v248_v31 }
  0xc0   : > { %v214_v33 = vpop.xlane.xlu1 %213  ;;  %v208_v34 = vpop.xlane.xlu0 %207 }
  0xc1   : > { %v258_v35 = vsel %vm254_vm1, %v214_v33, 0.0  ;;  %v255_v38 = vsel %vm254_vm1, %v208_v34, 0.0 }
  0xc4   : > { %v217_v36 = vpop.xlane.xlu1 %216  ;;  %v211_v37 = vpop.xlane.xlu0 %210 }
  0xc5   : > { %v259_v39 = vsel %vm254_vm1, %v217_v36, 0.0  ;;  %v256_v40 = vsel %vm254_vm1, %v211_v37, 0.0 }
  0xc6   : > { %v260_v41 = vadd.f32 %v259_v39, %v258_v35  ;;  %v257_v42 = vadd.f32 %v256_v40, %v255_v38 }
  0xc8   : > { %v280_v43 = vmul.f32 0.0078125, %v260_v41  ;;  %v279_v44 = vmul.f32 0.0078125, %v257_v42  ;;  %v223_v45 = vpop.xlane.xlu1 %222  ;;  %v220_v46 = vpop.xlane.xlu0 %219 }
  0xc9   : > { %v262_v47 = vsel %vm254_vm1, %v223_v45, 0.0  ;;  %v261_v48 = vsel %vm254_vm1, %v220_v46, 0.0 }
  0xca   : > { %v1352_v49 = vsub.f32 %v1266_v0, %v280_v43  ;;  %v1355_v50 = vsub.f32 %v1272_v2, %v280_v43  ;;  %v1358_v51 = vsub.f32 %v1269_v1, %v279_v44  ;;  %v1361_v52 = vsub.f32 %v1279_v5, %v279_v44 }
  0xcb   : > { %v263_v53 = vadd.f32 %v262_v47, %v261_v48 }
  0xcc   : > { %v304_v54 = vmul.f32 %v1361_v52, %v1361_v52  ;;  %v303_v55 = vmul.f32 %v1358_v51, %v1358_v51  ;;  %v229_v56 = vpop.xlane.xlu1 %228  ;;  %v226_v57 = vpop.xlane.xlu0 %225  ;;  %v306_v58 = vmul.f32 %v1355_v50, %v1355_v50  ;;  %v305_v1 = vmul.f32 %v1352_v49, %v1352_v49 }
  0xcd   : > { %v281_v59 = vmul.f32 0.0078125, %v263_v53  ;;  %v265_v60 = vsel %vm254_vm1, %v229_v56, 0.0  ;;  %v264_v61 = vsel %vm254_vm1, %v226_v57, 0.0 }
  0xce   : > { %v322_v62 = vsel %vm205_vm0, %v304_v54, 0.0  ;;  %v319_v63 = vsel %vm205_vm0, %v303_v55, 0.0  ;;  %v266_v0 = vadd.f32 %v265_v60, %v264_v61  ;;  %v328_v5 = vsel %vm205_vm0, %v306_v58, 0.0 }
  0xcf   : > { %v1376_v2 = vsub.f32 %v1289_v9, %v281_v59  ;;  %v1379_v3 = vsub.f32 %v1286_v8, %v281_v59  ;;  %323 = vadd.xlane.f32.xlu1 %v322_v62  ;;  %320 = vadd.xlane.f32.xlu0 %v319_v63  ;;  %v325_v18 = vsel %vm205_vm0, %v305_v1, 0.0 }
  0xd0   : > { %v282_v4 = vmul.f32 0.0078125, %v266_v0  ;;  %v235_v6 = vpop.xlane.xlu1 %234  ;;  %v232_v7 = vpop.xlane.xlu0 %231 }
  0xd1   : > { %v268_v10 = vsel %vm254_vm1, %v235_v6, 0.0  ;;  %v267_v11 = vsel %vm254_vm1, %v232_v7, 0.0  ;;  %v308_v14 = vmul.f32 %v1379_v3, %v1379_v3  ;;  %v307_v9 = vmul.f32 %v1376_v2, %v1376_v2  ;;  %v943_v6 = vld [vmem:[%s1673_s2] ss:$0 sm:$0xff]  ;;  %v947_v7 = vld [vmem:[%s1673_s2 + $0x4] ss:$0 sm:$0xff] }
  0xd2   : > { %v1389_v8 = vsub.f32 %v1299_v13, %v282_v4  ;;  %v1392_v15 = vsub.f32 %v1296_v12, %v282_v4  ;;  %v269_v19 = vadd.f32 %v268_v10, %v267_v11  ;;  %v944_v10 = vld [vmem:[%s1673_s2 + $0x1] ss:$0 sm:$0xff]  ;;  %v946_v11 = vld [vmem:[%s1673_s2 + $0x3] ss:$0 sm:$0xff] }
  0xd3   : > { %329 = vadd.xlane.f32.xlu1 %v328_v5  ;;  %326 = vadd.xlane.f32.xlu0 %v325_v18  ;;  %v334_v22 = vsel %vm205_vm0, %v308_v14, 0.0  ;;  %v331_v26 = vsel %vm205_vm0, %v307_v9, 0.0  ;;  %v948_v14 = vld [vmem:[%s1673_s2 + $0x5] ss:$0 sm:$0xff]  ;;  %v950_v9 = vld [vmem:[%s1673_s2 + $0x7] ss:$0 sm:$0xff] }
  0xd4   : > { %v283_v23 = vmul.f32 0.0078125, %v269_v19  ;;  %v241_v27 = vpop.xlane.xlu1 %240  ;;  %v238_v30 = vpop.xlane.xlu0 %237  ;;  %v310_v31 = vmul.f32 %v1392_v15, %v1392_v15  ;;  %v309_v13 = vmul.f32 %v1389_v8, %v1389_v8  ;;  %v952_v18 = vld [vmem:[%s1673_s2 + $0x9] ss:$0 sm:$0xff]  ;;  %v954_v19 = vld [vmem:[%s1673_s2 + $0xb] ss:$0 sm:$0xff] }
  0xd5   : > { %v271_v12 = vsel %vm254_vm1, %v241_v27, 0.0  ;;  %v270_v32 = vsel %vm254_vm1, %v238_v30, 0.0  ;;  %v949_v30 = vld [vmem:[%s1673_s2 + $0x6] ss:$0 sm:$0xff] }
  0xd6   : > { %v1404_v33 = vsub.f32 %v1309_v17, %v283_v23  ;;  %v1407_v34 = vsub.f32 %v1306_v16, %v283_v23  ;;  %v272_v35 = vadd.f32 %v271_v12, %v270_v32  ;;  %v340_v36 = vsel %vm205_vm0, %v310_v31, 0.0  ;;  %v951_v31 = vld [vmem:[%s1673_s2 + $0x8] ss:$0 sm:$0xff] }
  0xd7   : > { %335 = vadd.xlane.f32.xlu1 %v334_v22  ;;  %332 = vadd.xlane.f32.xlu0 %v331_v26  ;;  %v337_v38 = vsel %vm205_vm0, %v309_v13, 0.0  ;;  %v956_v22 = vld [vmem:[%s1673_s2 + $0xd] ss:$0 sm:$0xff]  ;;  %v955_v13 = vld [vmem:[%s1673_s2 + $0xc] ss:$0 sm:$0xff] }
  0xd8   : > { %v284_v37 = vmul.f32 0.0078125, %v272_v35  ;;  %v247_v39 = vpop.xlane.xlu1 %246  ;;  %v244_v40 = vpop.xlane.xlu0 %243  ;;  %v312_v41 = vmul.f32 %v1407_v34, %v1407_v34  ;;  %v311_v17 = vmul.f32 %v1404_v33, %v1404_v33 }
  0xd9   : > { %v274_v42 = vsel %vm254_vm1, %v247_v39, 0.0  ;;  %v273_v16 = vsel %vm254_vm1, %v244_v40, 0.0 }
  0xda   : > { %v1418_v43 = vsub.f32 %v1319_v21, %v284_v37  ;;  %v1421_v44 = vsub.f32 %v1316_v20, %v284_v37  ;;  %v275_v45 = vadd.f32 %v274_v42, %v273_v16  ;;  %v346_v46 = vsel %vm205_vm0, %v312_v41, 0.0 }
  0xdb   : > { %341 = vadd.xlane.f32.xlu1 %v340_v36  ;;  %338 = vadd.xlane.f32.xlu0 %v337_v38  ;;  %v343_v48 = vsel %vm205_vm0, %v311_v17, 0.0 }
  0xdc   : > { %v285_v47 = vmul.f32 0.0078125, %v275_v45  ;;  %v314_v53 = vmul.f32 %v1421_v44, %v1421_v44  ;;  %v313_v54 = vmul.f32 %v1418_v43, %v1418_v43  ;;  %v253_v55 = vpop.xlane.xlu1 %252  ;;  %v250_v21 = vpop.xlane.xlu0 %249 }
  0xdd   : > { %v277_v56 = vsel %vm254_vm1, %v253_v55, 0.0  ;;  %v276_v20 = vsel %vm254_vm1, %v250_v21, 0.0 }
  0xde   : > { %v1432_v57 = vsub.f32 %v1329_v25, %v285_v47  ;;  %v1435_v58 = vsub.f32 %v1326_v24, %v285_v47  ;;  %v278_v59 = vadd.f32 %v277_v56, %v276_v20  ;;  %v352_v60 = vsel %vm205_vm0, %v314_v53, 0.0 }
  0xdf   : > { %347 = vadd.xlane.f32.xlu1 %v346_v46  ;;  %344 = vadd.xlane.f32.xlu0 %v343_v48  ;;  %v349_v61 = vsel %vm205_vm0, %v313_v54, 0.0 }
  0xe0   : > { %v316_v62 = vmul.f32 %v1435_v58, %v1435_v58  ;;  %v315_v63 = vmul.f32 %v1432_v57, %v1432_v57  ;;  %v286_v0 = vmul.f32 0.0078125, %v278_v59 }
  0xe2   : > { %v1444_v25 = vsub.f32 %v1339_v29, %v286_v0  ;;  %v358_v24 = vsel %vm205_vm0, %v316_v62, 0.0  ;;  %v355_v1 = vsel %vm205_vm0, %v315_v63, 0.0  ;;  %v945_v29 = vld [vmem:[%s1673_s2 + $0x2] ss:$0 sm:$0xff]  ;;  %v1482_v23 = vsub.f32 %v1336_v28, %v286_v0  ;;  %v953_v28 = vld [vmem:[%s1673_s2 + $0xa] ss:$0 sm:$0xff] }
  0xe3   : > { %353 = vadd.xlane.f32.xlu1 %v352_v60  ;;  %350 = vadd.xlane.f32.xlu0 %v349_v61 }
  0xe4   : > { %v317_v4 = vmul.f32 %v1444_v25, %v1444_v25  ;;  %v318_v26 = vmul.f32 %v1482_v23, %v1482_v23 }
  0xe6   : > { %v361_v5 = vsel %vm205_vm0, %v317_v4, 0.0  ;;  %v364_v27 = vsel %vm205_vm0, %v318_v26, 0.0 }
  0xe7   : > { %359 = vadd.xlane.f32.xlu1 %v358_v24  ;;  %356 = vadd.xlane.f32.xlu0 %v355_v1 }
  0xeb   : > { %362 = vadd.xlane.f32.xlu0 %v361_v5 }
  0xf8   : > { %736 = vperm.xlu1 %1017, %v943_v6   ;;  %v928_v6 = vld [vmem:[%s1672_s1 + $0x1] ss:$0 sm:$0xff] }
  0xfc   : > { %744 = vperm.xlu1 %1017, %v945_v29   ;;  %v927_v29 = vld [vmem:[%s1672_s1] ss:$0 sm:$0xff] }
 0x100   : > { %752 = vperm.xlu1 %1017, %v947_v7  }
 0x101   : > { %740 = vperm.xlu0 %1018, %v944_v10  }
 0x105   : > { %748 = vperm.xlu0 %1018, %v946_v11  }
 0x109   : > { %756 = vperm.xlu0 %1018, %v948_v14  }
 0x10d   : > { %764 = vperm.xlu0 %1018, %v950_v9  }
 0x111   : > { %772 = vperm.xlu0 %1018, %v952_v18  }
 0x115   : > { %780 = vperm.xlu0 %1018, %v954_v19  }
 0x119   : > { %788 = vperm.xlu0 %1018, %v956_v22  }
 0x124   : > { %365 = vadd.xlane.f32.xlu1 %v364_v27 }
 0x135   : > { %760 = vperm.xlu1 %1017, %v949_v30  }
 0x139   : > { %768 = vperm.xlu1 %1017, %v951_v31   ;;  %v929_v31 = vld [vmem:[%s1672_s1 + $0x2] ss:$0 sm:$0xff] }
 0x13d   : > { %776 = vperm.xlu1 %1017, %v953_v28  }
 0x141   : > { %784 = vperm.xlu1 %1017, %v955_v13  }
 0x158   : > { %v324_v12 = vpop.xlane.xlu1 %323  ;;  %v321_v32 = vpop.xlane.xlu0 %320 }
 0x159   : > { %v368_v35 = vsel %vm254_vm1, %v324_v12, 0.0  ;;  %v367_v36 = vsel %vm254_vm1, %v321_v32, 0.0 }
 0x15a   : > { %v369_v37 = vadd.f32 %v368_v35, %v367_v36 }
 0x15c   : > { %v391_v38 = vmul.f32 0.0078125, %v369_v37  ;;  %v330_v39 = vpop.xlane.xlu1 %329  ;;  %v327_v40 = vpop.xlane.xlu0 %326 }
 0x15d   : > { %v371_v41 = vsel %vm254_vm1, %v330_v39, 0.0  ;;  %v370_v17 = vsel %vm254_vm1, %v327_v40, 0.0  ;;  %v930_v40 = vld [vmem:[%s1672_s1 + $0x3] ss:$0 sm:$0xff] }
 0x15e   : > { %v399_v42 = vadd.f32 1e-05, %v391_v38  ;;  %v372_v16 = vadd.f32 %v371_v41, %v370_v17 }
 0x160   : > { %1019 = vrsqrt.f32 %v399_v42  ;;  %v392_v45 = vmul.f32 0.0078125, %v372_v16  ;;  %v336_v46 = vpop.xlane.xlu1 %335  ;;  %v333_v47 = vpop.xlane.xlu0 %332 }
 0x161   : > { %v374_v48 = vsel %vm254_vm1, %v336_v46, 0.0  ;;  %v373_v53 = vsel %vm254_vm1, %v333_v47, 0.0  ;;  %v932_v47 = vld [vmem:[%s1672_s1 + $0x5] ss:$0 sm:$0xff] }
 0x162   : > { %v400_v54 = vadd.f32 1e-05, %v392_v45  ;;  %v375_v55 = vadd.f32 %v374_v48, %v373_v53  ;;  %v931_v45 = vld [vmem:[%s1672_s1 + $0x4] ss:$0 sm:$0xff]  ;;  %v936_v48 = vld [vmem:[%s1672_s1 + $0x9] ss:$0 sm:$0xff] }
 0x164   : > { %1021 = vrsqrt.f32 %v400_v54  ;;  %v393_v21 = vmul.f32 0.0078125, %v375_v55  ;;  %v342_v56 = vpop.xlane.xlu1 %341  ;;  %v339_v20 = vpop.xlane.xlu0 %338 }
 0x165   : > { %v377_v59 = vsel %vm254_vm1, %v342_v56, 0.0  ;;  %v376_v60 = vsel %vm254_vm1, %v339_v20, 0.0  ;;  %v933_v56 = vld [vmem:[%s1672_s1 + $0x6] ss:$0 sm:$0xff]  ;;  %v938_v20 = vld [vmem:[%s1672_s1 + $0xb] ss:$0 sm:$0xff] }
 0x166   : > { %v401_v61 = vadd.f32 1e-05, %v393_v21  ;;  %v378_v62 = vadd.f32 %v377_v59, %v376_v60 }
 0x168   : > { %v348_v63 = vpop.xlane.xlu1 %347  ;;  %v345_v0 = vpop.xlane.xlu0 %344  ;;  %v394_v24 = vmul.f32 0.0078125, %v378_v62  ;;  %1023 = vrsqrt.f32 %v401_v61  ;;  %v934_v62 = vld [vmem:[%s1672_s1 + $0x7] ss:$0 sm:$0xff] }
 0x169   : > { %v380_v1 = vsel %vm254_vm1, %v348_v63, 0.0  ;;  %v379_v4 = vsel %vm254_vm1, %v345_v0, 0.0  ;;  %v940_v63 = vld [vmem:[%s1672_s1 + $0xd] ss:$0 sm:$0xff] }
 0x16a   : > { %v381_v5 = vadd.f32 %v380_v1, %v379_v4  ;;  %v402_v9 = vadd.f32 1e-05, %v394_v24  ;;  %v935_v4 = vld [vmem:[%s1672_s1 + $0x8] ss:$0 sm:$0xff] }
 0x16c   : > { %v395_v7 = vmul.f32 0.0078125, %v381_v5  ;;  %v354_v10 = vpop.xlane.xlu1 %353  ;;  %v351_v11 = vpop.xlane.xlu0 %350 }
 0x16d   : > { %v1020_v14 = vpop.eup %1019  ;;  %v383_v18 = vsel %vm254_vm1, %v354_v10, 0.0  ;;  %v382_v19 = vsel %vm254_vm1, %v351_v11, 0.0 }
 0x16e   : > { %v403_v22 = vadd.f32 1e-05, %v395_v7  ;;  %v384_v26 = vadd.f32 %v383_v18, %v382_v19  ;;  %v544_v27 = vmul.f32 %v1020_v14, %v928_v6  ;;  %v543_v30 = vmul.f32 %v1020_v14, %v927_v29  ;;  %v937_v6 = vld [vmem:[%s1672_s1 + $0xa] ss:$0 sm:$0xff]  ;;  %v939_v7 = vld [vmem:[%s1672_s1 + $0xc] ss:$0 sm:$0xff] }
 0x170   : > { %1025 = vrsqrt.f32 %v403_v22  ;;  %v396_v28 = vmul.f32 0.0078125, %v384_v26  ;;  %v360_v13 = vpop.xlane.xlu1 %359  ;;  %566 = vperm.xlu1 %1017, %v544_v27   ;;  %561 = vperm.xlu0 %1018, %v543_v30   ;;  %v357_v12 = vpop.xlane.xlu0 %356 }
 0x171   : > { %v1022_v32 = vpop.eup %1021  ;;  %v386_v35 = vsel %vm254_vm1, %v360_v13, 0.0  ;;  %v385_v36 = vsel %vm254_vm1, %v357_v12, 0.0  ;;  %1027 = vrsqrt.f32 %v402_v9  ;;  %v941_v13 = vld [vmem:[%s1672_s1 + $0xe] ss:$0 sm:$0xff] }
 0x172   : > { %v404_v37 = vadd.f32 1e-05, %v396_v28  ;;  %v387_v38 = vadd.f32 %v386_v35, %v385_v36  ;;  %v545_v39 = vmul.f32 %v1022_v32, %v929_v31  ;;  %v546_v42 = vmul.f32 %v1022_v32, %v930_v40  ;;  %v942_v28 = vld [vmem:[%s1672_s1 + $0xf] ss:$0 sm:$0xff] }
 0x174   : > { %1029 = vrsqrt.f32 %v404_v37  ;;  %v397_v41 = vmul.f32 0.0078125, %v387_v38  ;;  %571 = vperm.xlu1 %1017, %v545_v39   ;;  %v737_v11 = vpop.permute.xlu1 %736  ;;  %v363_v18 = vpop.xlane.xlu0 %362  ;;  %v958_v37 = vld [vmem:[%s1673_s2 + $0xf] ss:$0 sm:$0xff]  ;;  %v957_v38 = vld [vmem:[%s1673_s2 + $0xe] ss:$0 sm:$0xff] }
 0x175   : > { %v1024_v16 = vpop.eup %1023  ;;  %v388_v19 = vsel %vm254_vm1, %v363_v18, 0.0 }
 0x176   : > { %v405_v17 = vadd.f32 1e-05, %v397_v41  ;;  %v547_v46 = vmul.f32 %v1024_v16, %v931_v45  ;;  %v548_v54 = vmul.f32 %v1024_v16, %v932_v47 }
 0x178   : > { %1031 = vrsqrt.f32 %v405_v17  ;;  %576 = vperm.xlu1 %1017, %v546_v42   ;;  %v745_v14 = vpop.permute.xlu1 %744 }
 0x17c   : > { %581 = vperm.xlu1 %1017, %v547_v46   ;;  %v753_v9 = vpop.permute.xlu1 %752  ;;  %v741_v12 = vpop.permute.xlu0 %740 }
 0x17d   : > { %v1026_v53 = vpop.eup %1025 }
 0x17e   : > { %v552_v55 = vmul.f32 %v1026_v53, %v936_v48  ;;  %v1028_v21 = vpop.eup %1027  ;;  %v551_v5 = vmul.f32 %v1026_v53, %v935_v4 }
 0x17f   : > { %v549_v60 = vmul.f32 %v1028_v21, %v933_v56  ;;  %v550_v24 = vmul.f32 %v1028_v21, %v934_v62 }
 0x180   : > { %586 = vperm.xlu1 %1017, %v548_v54   ;;  %606 = vperm.xlu0 %1018, %v552_v55   ;;  %v749_v39 = vpop.permute.xlu0 %748 }
 0x181   : > { %v1030_v59 = vpop.eup %1029 }
 0x182   : > { %v554_v61 = vmul.f32 %v1030_v59, %v938_v20  ;;  %v553_v29 = vmul.f32 %v1030_v59, %v937_v6 }
 0x184   : > { %591 = vperm.xlu1 %1017, %v549_v60   ;;  %616 = vperm.xlu0 %1018, %v554_v61   ;;  %v757_v40 = vpop.permute.xlu0 %756 }
 0x185   : > { %v1032_v0 = vpop.eup %1031 }
 0x186   : > { %v556_v1 = vmul.f32 %v1032_v0, %v940_v63  ;;  %v555_v10 = vmul.f32 %v1032_v0, %v939_v7 }
 0x188   : > { %596 = vperm.xlu1 %1017, %v550_v24   ;;  %626 = vperm.xlu0 %1018, %v556_v1   ;;  %v765_v41 = vpop.permute.xlu0 %764 }
 0x18c   : > { %601 = vperm.xlu1 %1017, %v551_v5   ;;  %v773_v42 = vpop.permute.xlu0 %772 }
 0x190   : > { %611 = vperm.xlu1 %1017, %v553_v29   ;;  %v781_v45 = vpop.permute.xlu0 %780 }
 0x194   : > { %621 = vperm.xlu1 %1017, %v555_v10   ;;  %v789_v47 = vpop.permute.xlu0 %788 }
 0x1ad   : > { %v366_v22 = vpop.xlane.xlu1 %365 }
 0x1ae   : > { %v389_v26 = vsel %vm254_vm1, %v366_v22, 0.0 }
 0x1af   : > { %v390_v27 = vadd.f32 %v389_v26, %v388_v19 }
 0x1b1   : > { %v398_v30 = vmul.f32 0.0078125, %v390_v27  ;;  %v761_v17 = vpop.permute.xlu1 %760 }
 0x1b3   : > { %v406_v31 = vadd.f32 1e-05, %v398_v30 }
 0x1b5   : > { %1033 = vrsqrt.f32 %v406_v31  ;;  %v769_v16 = vpop.permute.xlu1 %768 }
 0x1b9   : > { %v777_v46 = vpop.permute.xlu1 %776 }
 0x1bd   : > { %v785_v48 = vpop.permute.xlu1 %784 }
 0x1c2   : > { %v1034_v32 = vpop.eup %1033 }
 0x1c3   : > { %v558_v35 = vmul.f32 %v1034_v32, %v942_v28  ;;  %v557_v36 = vmul.f32 %v1034_v32, %v941_v13 }
 0x1c5   : > { %636 = vperm.xlu0 %1018, %v558_v35   ;;  %631 = vperm.xlu1 %1017, %v557_v36  }
 0x1c9   : > { %796 = vperm.xlu0 %1018, %v958_v37   ;;  %792 = vperm.xlu1 %1017, %v957_v38  }
 0x1eb   : > { %v567_v53 = vpop.permute.xlu1 %566  ;;  %v562_v54 = vpop.permute.xlu0 %561 }
 0x1ec   : > { %v640_v55 = vmul.f32 %v567_v53, %v1361_v52  ;;  %v639_v21 = vmul.f32 %v562_v54, %v1358_v51 }
 0x1ee   : > { %v800_v56 = vadd.f32 %v741_v12, %v640_v55  ;;  %v799_v20 = vadd.f32 %v737_v11, %v639_v21 }
 0x1ef   : > { %v572_v59 = vpop.permute.xlu1 %571 }
 0x1f0   : > { %816 = vst.msk [vmem:[%s1573_s23 + $0x4] sm:$0xf] %vm205_vm0, %v800_v56  ;;  %815 = vst.msk [vmem:[%s1573_s23] sm:$0xf] %vm205_vm0, %v799_v20  ;;  %v641_v60 = vmul.f32 %v572_v59, %v1352_v49 }
 0x1f2   : > { %v801_v52 = vadd.f32 %v745_v14, %v641_v60 }
 0x1f3   : > { %v577_v61 = vpop.permute.xlu1 %576 }
 0x1f4   : > { %817 = vst.msk [vmem:[%s1573_s23 + $0x8] sm:$0xf] %vm205_vm0, %v801_v52  ;;  %v642_v51 = vmul.f32 %v577_v61, %v1355_v50 }
 0x1f6   : > { %v802_v62 = vadd.f32 %v749_v39, %v642_v51 }
 0x1f7   : > { %v582_v63 = vpop.permute.xlu1 %581 }
 0x1f8   : > { %818 = vst.msk [vmem:[%s1573_s23 + $0xc] sm:$0xf] %vm205_vm0, %v802_v62  ;;  %v643_v0 = vmul.f32 %v582_v63, %v1376_v2 }
 0x1fa   : > { %v803_v24 = vadd.f32 %v753_v9, %v643_v0 }
 0x1fb   : > { %v587_v1 = vpop.permute.xlu1 %586  ;;  %v607_v4 = vpop.permute.xlu0 %606 }
 0x1fc   : > { %819 = vst.msk [vmem:[%s1573_s23 + $0x10] sm:$0xf] %vm205_vm0, %v803_v24  ;;  %v644_v49 = vmul.f32 %v587_v1, %v1379_v3  ;;  %v648_v5 = vmul.f32 %v607_v4, %v1407_v34 }
 0x1fe   : > { %v804_v6 = vadd.f32 %v757_v40, %v644_v49  ;;  %v808_v50 = vadd.f32 %v773_v42, %v648_v5 }
 0x1ff   : > { %v592_v29 = vpop.permute.xlu1 %591  ;;  %v617_v7 = vpop.permute.xlu0 %616 }
 0x200   : > { %820 = vst.msk [vmem:[%s1573_s23 + $0x14] sm:$0xf] %vm205_vm0, %v804_v6  ;;  %824 = vst.msk [vmem:[%s1573_s23 + $0x24] sm:$0xf] %vm205_vm0, %v808_v50  ;;  %v645_v2 = vmul.f32 %v592_v29, %v1389_v8  ;;  %v650_v10 = vmul.f32 %v617_v7, %v1421_v44 }
 0x202   : > { %v805_v11 = vadd.f32 %v761_v17, %v645_v2  ;;  %v810_v14 = vadd.f32 %v781_v45, %v650_v10 }
 0x203   : > { %v597_v3 = vpop.permute.xlu1 %596  ;;  %v627_v9 = vpop.permute.xlu0 %626 }
 0x204   : > { %821 = vst.msk [vmem:[%s1573_s23 + $0x18] sm:$0xf] %vm205_vm0, %v805_v11  ;;  %826 = vst.msk [vmem:[%s1573_s23 + $0x2c] sm:$0xf] %vm205_vm0, %v810_v14  ;;  %v646_v34 = vmul.f32 %v597_v3, %v1392_v15  ;;  %v652_v18 = vmul.f32 %v627_v9, %v1435_v58 }
 0x206   : > { %v806_v19 = vadd.f32 %v765_v41, %v646_v34  ;;  %v812_v22 = vadd.f32 %v789_v47, %v652_v18 }
 0x207   : > { %v602_v8 = vpop.permute.xlu1 %601 }
 0x208   : > { %822 = vst.msk [vmem:[%s1573_s23 + $0x1c] sm:$0xf] %vm205_vm0, %v806_v19  ;;  %828 = vst.msk [vmem:[%s1573_s23 + $0x34] sm:$0xf] %vm205_vm0, %v812_v22  ;;  %v647_v44 = vmul.f32 %v602_v8, %v1404_v33 }
 0x20a   : > { %v807_v26 = vadd.f32 %v769_v16, %v647_v44 }
 0x20b   : > { %v612_v27 = vpop.permute.xlu1 %611 }
 0x20c   : > { %823 = vst.msk [vmem:[%s1573_s23 + $0x20] sm:$0xf] %vm205_vm0, %v807_v26  ;;  %v649_v15 = vmul.f32 %v612_v27, %v1418_v43 }
 0x20e   : > { %v809_v30 = vadd.f32 %v777_v46, %v649_v15 }
 0x20f   : > { %v622_v58 = vpop.permute.xlu1 %621 }
 0x210   : > { %825 = vst.msk [vmem:[%s1573_s23 + $0x28] sm:$0xf] %vm205_vm0, %v809_v30  ;;  %v651_v31 = vmul.f32 %v622_v58, %v1432_v57 }
 0x212   : > { %v811_v28 = vadd.f32 %v785_v48, %v651_v31 }
 0x214   : > { %827 = vst.msk [vmem:[%s1573_s23 + $0x30] sm:$0xf] %vm205_vm0, %v811_v28 }
 0x240   : > { %v632_v13 = vpop.permute.xlu1 %631  ;;  %v637_v33 = vpop.permute.xlu0 %636 }
 0x241   : > { %v653_v12 = vmul.f32 %v632_v13, %v1444_v25  ;;  %v654_v43 = vmul.f32 %v637_v33, %v1482_v23 }
 0x244   : > { %v793_v32 = vpop.permute.xlu1 %792  ;;  %v797_v35 = vpop.permute.xlu0 %796 }
 0x245   : > { %v813_v57 = vadd.f32 %v793_v32, %v653_v12  ;;  %v814_v36 = vadd.f32 %v797_v35, %v654_v43 }
 0x247   : > { %829 = vst.msk [vmem:[%s1573_s23 + $0x38] sm:$0xf] %vm205_vm0, %v813_v57  ;;  %830 = vst.msk [vmem:[%s1573_s23 + $0x3c] sm:$0xf] %vm205_vm0, %v814_v36 }
 0x248   : > { %1076 = shalt.err (!%p1073_p10)
}
 0x249   : > { %s1077_s26 = scalar_lea.hbm %s1622_s8, 1024  ;;  %s1081_s29 = scalar_lea.hbm %s1674_s3, 2048 }
 0x24a   : > { %p1078_p0 = scmp.ne.s32.totalorder %s1622_s8, %s1077_s26  ;;  %p1082_p1 = scmp.lt.s32.totalorder %s1622_s8, %s1674_s3 }
 0x24b   : > { %p1083_p3 = scmp.lt.s32.totalorder %s1081_s29, %s1077_s26 }
 0x24c   : > { %p1079_p2 = pnand %p1078_p0, %p1683_p12 }
 0x24d   : > { %p1084_p6 = por %p1083_p3, %p1082_p1 }
 0x24e   : > { %p1080_p9 = pneg %p1079_p2 }
 0x250   : > { %p1085_p11 = pnand %p1084_p6, %p1080_p9 }
 0x252   : > { %1088 = shalt.err (!%p1085_p11)
}
 0x253   : > { %s1134_s11 = smov 64   ;;  %s1135_s23 = smov 4  }
 0x254   : > { %968 = dma.vmem_to_hbm [thread:$0]  (%p1683_p12), %s1624_s4, 1024, %s1622_s8, %s832_s16, %s1134_s11, %s1134_s11, %s1135_s23  }
 0x255 PF: > { %s860_s9 = sand.u32 1, %s1115_s12   ;;  %p1684_p13 = scmp.ne.s32.totalorder %s1680_s25, 0 }
 0x256   : > { %p1685_p4 = scmp.ge.s32.totalorder %s1127_s15, 2  ;;  %s861_s6 = scalar_lea.sflag [#allocation4], %s860_s9 }
 0x258   : > { %p975_p5 = pnand %p1685_p4, %p1684_p13 }
 0x25a   : > { %p976_p7 = pneg %p975_p5 }
 0x25c   : > { %1110 = dma.done.wait (%p976_p7), %s861_s6, 1024  }
 0x25d   : > { %1112 = vsyncadd (%p976_p7), %s861_s6, 4294966272  ;;  %p16_p8 = scmp.ge.s32.totalorder %s1181_s18, 4   ;;  %s1686_s12 = smov %s1119_s13 }
 0x25e   : > { %s1687_s13 = smov %s1123_s14  ;;  %s1688_s14 = smov %s1193_s21 }
 0x25f   : > { %s1689_s15 = smov %s1181_s18  ;;  %18 = sbr.rel (!%p16_p8) target bundleno = 5 (0x5), region = 77 }
 0x264   :  { %866 = vsyncpa [#allocation3], 1 }
 0x265   :  { %868 = vsyncpa [#allocation3 + $0x1], 1 }
 0x266   :  { %869 = vsyncpa [#allocation4], 1 }
 0x267   :  { %871 = vsyncpa [#allocation4 + $0x1], 1 }

</bundles_post_ra>
